<compile_context>
chip_gen: v7x
topology: tpu7x:2x2x1
jax: 0.10.0
libtpu: 0.0.40
codegen_flags: <defaults>
</compile_context>

<pallas_src>
import jax
import jax.numpy as jnp
from jax.experimental import pallas as pl
from jax.experimental.pallas import tpu as pltpu

LN_EPS = 1e-5  # PyTorch nn.LayerNorm default


def _ln_relu_cols(h, gamma, beta):
    """LayerNorm over axis 0 (features) of a (features, batch_tile) f32 tile,
    fused with ReLU.  Single-pass (biased) variance: E[h^2] - mean^2."""
    n = h.shape[0]
    inv_n = 1.0 / n
    mean = jnp.sum(h, axis=0, keepdims=True) * inv_n
    meansq = jnp.sum(h * h, axis=0, keepdims=True) * inv_n
    var = jnp.maximum(meansq - mean * mean, 0.0)
    inv = jax.lax.rsqrt(var + LN_EPS)
    return jnp.maximum((h - mean) * inv * gamma + beta, 0.0)


def annotator_kernel(
    x_ref,                                   # (TB, F)  bf16 (natural layout)
    w1_ref, b1_ref, g1_ref, be1_ref,         # (32, F) bf16, (32,1), (32,1), (32,1) f32
    w2_ref, b2_ref, g2_ref, be2_ref,         # (32,32), (32,1), (32,1), (32,1) f32
    w3_ref, b3_ref,                          # (A, 32), (A, 1) f32
    o_ref,                                   # (A, TB)  f32, lane-dense
):
    # fc1: contract the feature axis of both operands -> (32, TB) with the
    # batch on the lane axis.  bf16 x / bf16 w1 on the MXU, f32 accumulate.
    h = jax.lax.dot_general(
        w1_ref[...], x_ref[...],
        dimension_numbers=(((1,), (1,)), ((), ())),
        preferred_element_type=jnp.float32,
    ) + b1_ref[...]
    h = _ln_relu_cols(h, g1_ref[...], be1_ref[...])

    # fc2 -> ln2 -> relu   (tiny f32 weights; h stays f32, no cast sweeps)
    h = jnp.dot(w2_ref[...], h, preferred_element_type=jnp.float32) + b2_ref[...]
    h = _ln_relu_cols(h, g2_ref[...], be2_ref[...])

    # out -> sigmoid
    logits = jnp.dot(w3_ref[...], h, preferred_element_type=jnp.float32) + b3_ref[...]
    o_ref[...] = jax.nn.sigmoid(logits).astype(o_ref.dtype)


def annotator_forward(x, params, *, block_b=16384):
    """x: (B, n_features) float array. params: PyTorch-layout weights/biases.

    Returns sigmoid probabilities of shape (B, n_annotators), float32.
    """
    B, F = x.shape
    H = params["w1"].shape[0]
    A = params["w3"].shape[0]

    # Batch tile.  16K columns keeps each grid step well above the fixed
    # ~0.35 us/step pipeline overhead while the live (32, TB) f32 temps
    # (~2 MiB each) stay comfortably inside the VMEM budget on all of
    # v5e / v6e / v7x (64 MiB physical on v7x).
    TB = min(block_b, B)
    n_blocks = pl.cdiv(B, TB)

    col = lambda v: v.reshape(-1, 1).astype(jnp.float32)
    args = (
        x.astype(jnp.bfloat16),
        params["w1"].astype(jnp.bfloat16), col(params["b1"]),
        col(params["g1"]), col(params["be1"]),
        params["w2"].astype(jnp.float32), col(params["b2"]),
        col(params["g2"]), col(params["be2"]),
        params["w3"].astype(jnp.float32), col(params["b3"]),
    )

    # x tile marches along the batch (sublane) axis in its natural layout;
    # every parameter is a full-array block with a constant index map and
    # stays VMEM-resident across grid steps.  Output is lane-dense (A, TB).
    x_spec = pl.BlockSpec((TB, F), lambda i: (i, 0))
    param_specs = [pl.BlockSpec(a.shape, lambda i: (0, 0)) for a in args[1:]]
    out_spec = pl.BlockSpec((A, TB), lambda i: (0, i))

    param_bytes = sum(int(a.size) * a.dtype.itemsize for a in args[1:])
    cost = pl.CostEstimate(
        flops=2 * B * (F * H + H * H + H * A) + 12 * B * H,
        transcendentals=B * (A + 2),               # sigmoid + 2x rsqrt per row
        bytes_accessed=B * F * 2 + B * A * 4 + param_bytes,
    )

    out_t = pl.pallas_call(
        annotator_kernel,
        out_shape=jax.ShapeDtypeStruct((A, B), jnp.float32),
        grid=(n_blocks,),
        in_specs=[x_spec] + param_specs,
        out_specs=out_spec,
        compiler_params=pltpu.CompilerParams(
            dimension_semantics=("parallel",),
            vmem_limit_bytes=48 * 1024 * 1024,
        ),
        cost_estimate=cost,
    )(*args)

    # Single tiny (A, B) -> (B, A) pass to preserve the PyTorch return layout.
    # Callers that can consume (A, B) directly should skip this.
    return jnp.transpose(out_t)


def init_params(key, n_features, n_annotators, hidden=32):
    """Deterministic synthetic init mirroring PyTorch shapes exactly:
    Linear weight (out, in), bias (out,), LayerNorm gamma/beta (hidden,)."""
    ks = jax.random.split(key, 3)

    def lin(k, fan_in, fan_out):
        kw, kb = jax.random.split(k)
        bound = 1.0 / jnp.sqrt(fan_in)
        w = jax.random.uniform(kw, (fan_out, fan_in), jnp.float32, -bound, bound)
        b = jax.random.uniform(kb, (fan_out,), jnp.float32, -bound, bound)
        return w, b

    w1, b1 = lin(ks[0], n_features, hidden)
    w2, b2 = lin(ks[1], hidden, hidden)
    w3, b3 = lin(ks[2], hidden, n_annotators)

    return {
        "w1": w1, "b1": b1,
        "g1": jnp.ones((hidden,), jnp.float32), "be1": jnp.zeros((hidden,), jnp.float32),
        "w2": w2, "b2": b2,
        "g2": jnp.ones((hidden,), jnp.float32), "be2": jnp.zeros((hidden,), jnp.float32),
        "w3": w3, "b3": b3,
    }


def reference_forward(x, p, *, bf16_io=True):
    """Pure-JAX reference (row-major, PyTorch semantics).

    With bf16_io=True the first layer uses the same bf16 x / bf16 w1 inputs
    (f32 accumulate) as the kernel, so tolerances can stay tight."""
    def ln(h, g, b):
        m = jnp.mean(h, -1, keepdims=True)
        v = jnp.mean(jnp.square(h - m), -1, keepdims=True)
        return (h - m) * jax.lax.rsqrt(v + LN_EPS) * g + b

    if bf16_io:
        h = jnp.dot(x.astype(jnp.bfloat16), p["w1"].astype(jnp.bfloat16).T,
                    preferred_element_type=jnp.float32) + p["b1"]
    else:
        h = x @ p["w1"].T + p["b1"]
    h = jnp.maximum(ln(h, p["g1"], p["be1"]), 0.0)
    h = jnp.maximum(ln(h @ p["w2"].T + p["b2"], p["g2"], p["be2"]), 0.0)
    return jax.nn.sigmoid(h @ p["w3"].T + p["b3"])


if __name__ == "__main__":
    key = jax.random.PRNGKey(0)
    k_param, k_x1, k_x2 = jax.random.split(key, 3)

    n_features = 16
    n_annotators = 4
    params = init_params(k_param, n_features, n_annotators)

    # Small single-tile check.
    batch = 8
    x = jax.random.normal(k_x1, (batch, n_features), jnp.float32)
    out = jax.block_until_ready(annotator_forward(x, params))
    ref = reference_forward(x, params)                 # precision-matched ref
    ref_f32 = reference_forward(x, params, bf16_io=False)
    assert out.shape == (batch, n_annotators)
    assert jnp.allclose(out, ref, atol=2e-3, rtol=2e-3), "mismatch vs bf16 reference (small)"
    assert jnp.allclose(out, ref_f32, atol=5e-2, rtol=5e-2), "mismatch vs f32 reference (small)"

    # Multi-block + ragged-tail check (batch not a multiple of the tile).
    batch2 = 300
    x2 = jax.random.normal(k_x2, (batch2, n_features), jnp.float32)
    out2 = jax.block_until_ready(annotator_forward(x2, params, block_b=128))
    ref2 = reference_forward(x2, params)
    assert out2.shape == (batch2, n_annotators)
    assert jnp.allclose(out2, ref2, atol=2e-3, rtol=2e-3), "mismatch vs reference (tiled)"
    assert bool(jnp.all(jnp.isfinite(out2))), "non-finite values in valid region"

    print("KERNEL_OK")
</pallas_src>

<mosaic_0001>
module attributes {stable_mosaic.version = 11 : i64} {
  func.func @annotator_kernel(%arg0: i32, %arg1: memref<8x16xbf16, #tpu.memory_space<vmem>>, %arg2: memref<32x16xbf16, #tpu.memory_space<vmem>>, %arg3: memref<32x1xf32, #tpu.memory_space<vmem>>, %arg4: memref<32x1xf32, #tpu.memory_space<vmem>>, %arg5: memref<32x1xf32, #tpu.memory_space<vmem>>, %arg6: memref<32x32xf32, #tpu.memory_space<vmem>>, %arg7: memref<32x1xf32, #tpu.memory_space<vmem>>, %arg8: memref<32x1xf32, #tpu.memory_space<vmem>>, %arg9: memref<32x1xf32, #tpu.memory_space<vmem>>, %arg10: memref<4x32xf32, #tpu.memory_space<vmem>>, %arg11: memref<4x1xf32, #tpu.memory_space<vmem>>, %arg12: memref<4x8xf32, #tpu.memory_space<vmem>>) attributes {dimension_semantics = [#tpu.dimension_semantics<parallel>], iteration_bounds = array<i64: 1>, scalar_prefetch = 0 : i64, scratch_operands = 0 : i64, tpu.core_type = #tpu.core_type<tc>, window_params = [{transform_indices = @transform_0, window_bounds = array<i64: 8, 16>}, {pipeline_mode = #tpu.pipeline_mode<synchronous>, transform_indices = @transform_1, window_bounds = array<i64: 32, 16>}, {pipeline_mode = #tpu.pipeline_mode<synchronous>, transform_indices = @transform_2, window_bounds = array<i64: 32, 1>}, {pipeline_mode = #tpu.pipeline_mode<synchronous>, transform_indices = @transform_3, window_bounds = array<i64: 32, 1>}, {pipeline_mode = #tpu.pipeline_mode<synchronous>, transform_indices = @transform_4, window_bounds = array<i64: 32, 1>}, {pipeline_mode = #tpu.pipeline_mode<synchronous>, transform_indices = @transform_5, window_bounds = array<i64: 32, 32>}, {pipeline_mode = #tpu.pipeline_mode<synchronous>, transform_indices = @transform_6, window_bounds = array<i64: 32, 1>}, {pipeline_mode = #tpu.pipeline_mode<synchronous>, transform_indices = @transform_7, window_bounds = array<i64: 32, 1>}, {pipeline_mode = #tpu.pipeline_mode<synchronous>, transform_indices = @transform_8, window_bounds = array<i64: 32, 1>}, {pipeline_mode = #tpu.pipeline_mode<synchronous>, transform_indices = @transform_9, window_bounds = array<i64: 4, 32>}, {pipeline_mode = #tpu.pipeline_mode<synchronous>, transform_indices = @transform_10, window_bounds = array<i64: 4, 1>}, {transform_indices = @transform_11, window_bounds = array<i64: 4, 8>}]} {
    %c0 = arith.constant 0 : index
    %c0_0 = arith.constant 0 : index
    %0 = vector.load %arg2[%c0, %c0_0] : memref<32x16xbf16, #tpu.memory_space<vmem>>, vector<32x16xbf16>
    %c0_1 = arith.constant 0 : index
    %c0_2 = arith.constant 0 : index
    %1 = vector.load %arg1[%c0_1, %c0_2] : memref<8x16xbf16, #tpu.memory_space<vmem>>, vector<8x16xbf16>
    %cst = arith.constant dense<0.000000e+00> : vector<32x8xf32>
    %2 = tpu.matmul %0, %1, %cst {dimension_numbers = #tpu.dot_dimension_numbers<[1], [1], [0], [0], [0, 0, 1, 0], [], []>} : vector<32x16xbf16>, vector<8x16xbf16>, vector<32x8xf32> -> vector<32x8xf32>
    %c0_3 = arith.constant 0 : index
    %c0_4 = arith.constant 0 : index
    %3 = vector.load %arg3[%c0_3, %c0_4] : memref<32x1xf32, #tpu.memory_space<vmem>>, vector<32x1xf32>
    %4 = vector.broadcast %3 : vector<32x1xf32> to vector<32x8xf32>
    %5 = arith.addf %2, %4 : vector<32x8xf32>
    %c0_5 = arith.constant 0 : index
    %c0_6 = arith.constant 0 : index
    %6 = vector.load %arg4[%c0_5, %c0_6] : memref<32x1xf32, #tpu.memory_space<vmem>>, vector<32x1xf32>
    %c0_7 = arith.constant 0 : index
    %c0_8 = arith.constant 0 : index
    %7 = vector.load %arg5[%c0_7, %c0_8] : memref<32x1xf32, #tpu.memory_space<vmem>>, vector<32x1xf32>
    %cst_9 = arith.constant dense<0.000000e+00> : vector<8xf32>
    %8 = vector.multi_reduction <add>, %5, %cst_9 [0] : vector<32x8xf32> to vector<8xf32>
    %9 = vector.shape_cast %8 : vector<8xf32> to vector<1x8xf32>
    %cst_10 = arith.constant 3.125000e-02 : f32
    %10 = vector.broadcast %cst_10 : f32 to vector<1x8xf32>
    %11 = arith.mulf %9, %10 : vector<1x8xf32>
    %12 = arith.mulf %5, %5 : vector<32x8xf32>
    %cst_11 = arith.constant dense<0.000000e+00> : vector<8xf32>
    %13 = vector.multi_reduction <add>, %12, %cst_11 [0] : vector<32x8xf32> to vector<8xf32>
    %14 = vector.shape_cast %13 : vector<8xf32> to vector<1x8xf32>
    %cst_12 = arith.constant 3.125000e-02 : f32
    %15 = vector.broadcast %cst_12 : f32 to vector<1x8xf32>
    %16 = arith.mulf %14, %15 : vector<1x8xf32>
    %17 = arith.mulf %11, %11 : vector<1x8xf32>
    %18 = arith.subf %16, %17 : vector<1x8xf32>
    %cst_13 = arith.constant 0.000000e+00 : f32
    %19 = vector.broadcast %cst_13 : f32 to vector<1x8xf32>
    %20 = arith.maximumf %18, %19 : vector<1x8xf32>
    %cst_14 = arith.constant 9.99999974E-6 : f32
    %21 = vector.broadcast %cst_14 : f32 to vector<1x8xf32>
    %22 = arith.addf %20, %21 : vector<1x8xf32>
    %23 = math.rsqrt %22 : vector<1x8xf32>
    %24 = vector.broadcast %11 : vector<1x8xf32> to vector<32x8xf32>
    %25 = arith.subf %5, %24 : vector<32x8xf32>
    %26 = vector.broadcast %23 : vector<1x8xf32> to vector<32x8xf32>
    %27 = arith.mulf %25, %26 : vector<32x8xf32>
    %28 = vector.broadcast %6 : vector<32x1xf32> to vector<32x8xf32>
    %29 = arith.mulf %27, %28 : vector<32x8xf32>
    %30 = vector.broadcast %7 : vector<32x1xf32> to vector<32x8xf32>
    %31 = arith.addf %29, %30 : vector<32x8xf32>
    %cst_15 = arith.constant 0.000000e+00 : f32
    %32 = vector.broadcast %cst_15 : f32 to vector<32x8xf32>
    %33 = arith.maximumf %31, %32 : vector<32x8xf32>
    %c0_16 = arith.constant 0 : index
    %c0_17 = arith.constant 0 : index
    %34 = vector.load %arg6[%c0_16, %c0_17] : memref<32x32xf32, #tpu.memory_space<vmem>>, vector<32x32xf32>
    %cst_18 = arith.constant dense<0.000000e+00> : vector<32x8xf32>
    %35 = tpu.matmul %34, %33, %cst_18 {dimension_numbers = #tpu.dot_dimension_numbers<[1], [0], [0], [1], [0, 0, 1, 1], [], []>} : vector<32x32xf32>, vector<32x8xf32>, vector<32x8xf32> -> vector<32x8xf32>
    %c0_19 = arith.constant 0 : index
    %c0_20 = arith.constant 0 : index
    %36 = vector.load %arg7[%c0_19, %c0_20] : memref<32x1xf32, #tpu.memory_space<vmem>>, vector<32x1xf32>
    %37 = vector.broadcast %36 : vector<32x1xf32> to vector<32x8xf32>
    %38 = arith.addf %35, %37 : vector<32x8xf32>
    %c0_21 = arith.constant 0 : index
    %c0_22 = arith.constant 0 : index
    %39 = vector.load %arg8[%c0_21, %c0_22] : memref<32x1xf32, #tpu.memory_space<vmem>>, vector<32x1xf32>
    %c0_23 = arith.constant 0 : index
    %c0_24 = arith.constant 0 : index
    %40 = vector.load %arg9[%c0_23, %c0_24] : memref<32x1xf32, #tpu.memory_space<vmem>>, vector<32x1xf32>
    %cst_25 = arith.constant dense<0.000000e+00> : vector<8xf32>
    %41 = vector.multi_reduction <add>, %38, %cst_25 [0] : vector<32x8xf32> to vector<8xf32>
    %42 = vector.shape_cast %41 : vector<8xf32> to vector<1x8xf32>
    %cst_26 = arith.constant 3.125000e-02 : f32
    %43 = vector.broadcast %cst_26 : f32 to vector<1x8xf32>
    %44 = arith.mulf %42, %43 : vector<1x8xf32>
    %45 = arith.mulf %38, %38 : vector<32x8xf32>
    %cst_27 = arith.constant dense<0.000000e+00> : vector<8xf32>
    %46 = vector.multi_reduction <add>, %45, %cst_27 [0] : vector<32x8xf32> to vector<8xf32>
    %47 = vector.shape_cast %46 : vector<8xf32> to vector<1x8xf32>
    %cst_28 = arith.constant 3.125000e-02 : f32
    %48 = vector.broadcast %cst_28 : f32 to vector<1x8xf32>
    %49 = arith.mulf %47, %48 : vector<1x8xf32>
    %50 = arith.mulf %44, %44 : vector<1x8xf32>
    %51 = arith.subf %49, %50 : vector<1x8xf32>
    %cst_29 = arith.constant 0.000000e+00 : f32
    %52 = vector.broadcast %cst_29 : f32 to vector<1x8xf32>
    %53 = arith.maximumf %51, %52 : vector<1x8xf32>
    %cst_30 = arith.constant 9.99999974E-6 : f32
    %54 = vector.broadcast %cst_30 : f32 to vector<1x8xf32>
    %55 = arith.addf %53, %54 : vector<1x8xf32>
    %56 = math.rsqrt %55 : vector<1x8xf32>
    %57 = vector.broadcast %44 : vector<1x8xf32> to vector<32x8xf32>
    %58 = arith.subf %38, %57 : vector<32x8xf32>
    %59 = vector.broadcast %56 : vector<1x8xf32> to vector<32x8xf32>
    %60 = arith.mulf %58, %59 : vector<32x8xf32>
    %61 = vector.broadcast %39 : vector<32x1xf32> to vector<32x8xf32>
    %62 = arith.mulf %60, %61 : vector<32x8xf32>
    %63 = vector.broadcast %40 : vector<32x1xf32> to vector<32x8xf32>
    %64 = arith.addf %62, %63 : vector<32x8xf32>
    %cst_31 = arith.constant 0.000000e+00 : f32
    %65 = vector.broadcast %cst_31 : f32 to vector<32x8xf32>
    %66 = arith.maximumf %64, %65 : vector<32x8xf32>
    %c0_32 = arith.constant 0 : index
    %c0_33 = arith.constant 0 : index
    %67 = vector.load %arg10[%c0_32, %c0_33] : memref<4x32xf32, #tpu.memory_space<vmem>>, vector<4x32xf32>
    %cst_34 = arith.constant dense<0.000000e+00> : vector<4x8xf32>
    %68 = tpu.matmul %67, %66, %cst_34 {dimension_numbers = #tpu.dot_dimension_numbers<[1], [0], [0], [1], [0, 0, 1, 1], [], []>} : vector<4x32xf32>, vector<32x8xf32>, vector<4x8xf32> -> vector<4x8xf32>
    %c0_35 = arith.constant 0 : index
    %c0_36 = arith.constant 0 : index
    %69 = vector.load %arg11[%c0_35, %c0_36] : memref<4x1xf32, #tpu.memory_space<vmem>>, vector<4x1xf32>
    %70 = vector.broadcast %69 : vector<4x1xf32> to vector<4x8xf32>
    %71 = arith.addf %68, %70 : vector<4x8xf32>
    %72 = arith.negf %71 : vector<4x8xf32>
    %73 = math.exp %72 : vector<4x8xf32>
    %cst_37 = arith.constant 1.000000e+00 : f32
    %74 = vector.broadcast %cst_37 : f32 to vector<4x8xf32>
    %75 = arith.addf %74, %73 : vector<4x8xf32>
    %76 = arith.divf %74, %75 : vector<4x8xf32>
    %c0_38 = arith.constant 0 : index
    %c0_39 = arith.constant 0 : index
    %77 = vector.load %arg12[%c0_38, %c0_39] : memref<4x8xf32, #tpu.memory_space<vmem>>, vector<4x8xf32>
    tpu.vector_store %arg12[%c0_38, %c0_39], %76 {strides = array<i32>} : memref<4x8xf32, #tpu.memory_space<vmem>>, vector<4x8xf32>,
    return
  }
  func.func @transform_0(%arg0: i32) -> (i32, i32) {
    %c0_i32 = arith.constant 0 : i32
    %c0_i32_0 = arith.constant 0 : i32
    return %arg0, %c0_i32 : i32, i32
  }
  func.func @transform_1(%arg0: i32) -> (i32, i32) {
    %c0_i32 = arith.constant 0 : i32
    %c0_i32_0 = arith.constant 0 : i32
    %c0_i32_1 = arith.constant 0 : i32
    return %c0_i32, %c0_i32_0 : i32, i32
  }
  func.func @transform_2(%arg0: i32) -> (i32, i32) {
    %c0_i32 = arith.constant 0 : i32
    %c0_i32_0 = arith.constant 0 : i32
    %c0_i32_1 = arith.constant 0 : i32
    return %c0_i32, %c0_i32_0 : i32, i32
  }
  func.func @transform_3(%arg0: i32) -> (i32, i32) {
    %c0_i32 = arith.constant 0 : i32
    %c0_i32_0 = arith.constant 0 : i32
    %c0_i32_1 = arith.constant 0 : i32
    return %c0_i32, %c0_i32_0 : i32, i32
  }
  func.func @transform_4(%arg0: i32) -> (i32, i32) {
    %c0_i32 = arith.constant 0 : i32
    %c0_i32_0 = arith.constant 0 : i32
    %c0_i32_1 = arith.constant 0 : i32
    return %c0_i32, %c0_i32_0 : i32, i32
  }
  func.func @transform_5(%arg0: i32) -> (i32, i32) {
    %c0_i32 = arith.constant 0 : i32
    %c0_i32_0 = arith.constant 0 : i32
    %c0_i32_1 = arith.constant 0 : i32
    return %c0_i32, %c0_i32_0 : i32, i32
  }
  func.func @transform_6(%arg0: i32) -> (i32, i32) {
    %c0_i32 = arith.constant 0 : i32
    %c0_i32_0 = arith.constant 0 : i32
    %c0_i32_1 = arith.constant 0 : i32
    return %c0_i32, %c0_i32_0 : i32, i32
  }
  func.func @transform_7(%arg0: i32) -> (i32, i32) {
    %c0_i32 = arith.constant 0 : i32
    %c0_i32_0 = arith.constant 0 : i32
    %c0_i32_1 = arith.constant 0 : i32
    return %c0_i32, %c0_i32_0 : i32, i32
  }
  func.func @transform_8(%arg0: i32) -> (i32, i32) {
    %c0_i32 = arith.constant 0 : i32
    %c0_i32_0 = arith.constant 0 : i32
    %c0_i32_1 = arith.constant 0 : i32
    return %c0_i32, %c0_i32_0 : i32, i32
  }
  func.func @transform_9(%arg0: i32) -> (i32, i32) {
    %c0_i32 = arith.constant 0 : i32
    %c0_i32_0 = arith.constant 0 : i32
    %c0_i32_1 = arith.constant 0 : i32
    return %c0_i32, %c0_i32_0 : i32, i32
  }
  func.func @transform_10(%arg0: i32) -> (i32, i32) {
    %c0_i32 = arith.constant 0 : i32
    %c0_i32_0 = arith.constant 0 : i32
    %c0_i32_1 = arith.constant 0 : i32
    return %c0_i32, %c0_i32_0 : i32, i32
  }
  func.func @transform_11(%arg0: i32) -> (i32, i32) {
    %c0_i32 = arith.constant 0 : i32
    %c0_i32_0 = arith.constant 0 : i32
    return %c0_i32, %arg0 : i32, i32
  }
}

</mosaic_0001>

<bundles_post_ra>
// kernel: tpu_custom_call.1
= control target key start
LH: loop header
LB: loop body
LE: loop exit
PB: predicated region body
PF: predicated region fallthrough
CT: control target
= control target key end

     0   :  { %vm79_vm0 = vcmask 130048   ;;  %v690_v4 = vmov 0   ;;  %s893_s0 = inlined_call_operand.vmem [shape: bf16[8,16], index: 0, kind: input, shape index: {}]   ;;  %s894_s1 = inlined_call_operand.vmem [shape: bf16[32,16], index: 1, kind: input, shape index: {}]   ;;  %s895_s2 = inlined_call_operand.vmem [shape: f32[32,1], index: 2, kind: input, shape index: {}]   ;;  %s896_s3 = inlined_call_operand.vmem [shape: f32[32,1], index: 3, kind: input, shape index: {}]   ;;  %s897_s4 = inlined_call_operand.vmem [shape: f32[32,1], index: 4, kind: input, shape index: {}]   ;;  %s898_s5 = inlined_call_operand.vmem [shape: f32[32,32], index: 5, kind: input, shape index: {}]   ;;  %s899_s6 = inlined_call_operand.vmem [shape: f32[32,1], index: 6, kind: input, shape index: {}]   ;;  %s900_s7 = inlined_call_operand.vmem [shape: f32[32,1], index: 7, kind: input, shape index: {}]   ;;  %s901_s8 = inlined_call_operand.vmem [shape: f32[32,1], index: 8, kind: input, shape index: {}]   ;;  %s902_s9 = inlined_call_operand.vmem [shape: f32[4,32], index: 9, kind: input, shape index: {}]   ;;  %s903_s10 = inlined_call_operand.vmem [shape: f32[4,1], index: 10, kind: input, shape index: {}]   ;;  %s904_s11 = inlined_call_operand.hbm [shape: f32[4,8], index: 11, kind: output, shape index: {}]  }
   0x1   :  { %v44_v0 = vld [vmem:[%s893_s0] sm:$0xf]  ;;  %654 = vset.pattern.permute.xlu0 %v690_v4  ;;  %655 = vset.pattern.permute.xlu1 %v690_v4  ;;  %v47_v5 = vld [vmem:[%s895_s2 + $0x10] sm:$0xff]  ;;  %v657_v6 = vld [vmem:[%s894_s1 + $0x8] sm:$0xff]  }
   0x2   :  { %v656_v1 = vld [vmem:[%s894_s1] sm:$0xff]   ;;  %648 = vmatprep.subr.msk.bf16.mxu0 %vm79_vm0, %v44_v0  ;;  %v87_v2 = vsel %vm79_vm0, %v44_v0, 0  ;;  %61 = vperm.xlu1 %655, %v47_v5   ;;  %v46_v7 = vld [vmem:[%s895_s2 + $0x8] sm:$0xff]  ;;  %v48_v8 = vld [vmem:[%s895_s2 + $0x18] sm:$0xff] }
   0x3   :  { %604 = vmatpush3.bf16.xpose.msra.mxu0 %v87_v2  ;;  %605 = vmatprep.mubr.msk.bf16.mxu0 %vm79_vm0, %v656_v1  ;;  %v45_v3 = vld [vmem:[%s895_s2] sm:$0xff]  ;;  %v139_v10 = vld [vmem:[%s896_s3 + $0x8] sm:$0xff] }
   0x4   :  { %51 = vperm.xlu0 %654, %v45_v3   ;;  %v138_v9 = vld [vmem:[%s896_s3] sm:$0xff] }
   0x6   :  { %66 = vperm.xlu1 %655, %v48_v8  }
   0x8   :  { %56 = vperm.xlu0 %654, %v46_v7  }
   0xa   :  { %606 = vmatmul.mubr.msk.bf16.vlgmr.msra.gmra.mrb[0].mxu0 %vm79_vm0, %v657_v6 }
   0xb   :  { %16 = vsyncpa [#allocation3], 0  ;;  %199 = vperm.xlu1 %655, %v139_v10   ;;  %v142_v11 = vld [vmem:[%s897_s4] sm:$0xff]  ;;  %v143_v12 = vld [vmem:[%s897_s4 + $0x8] sm:$0xff]  ;;  %vm272_vm1 = vcmask 261120   ;;  %vm146_vm2 = vcmask 64512  }
   0xc   :  { %194 = vperm.xlu0 %654, %v138_v9   ;;  %v140_v13 = vld [vmem:[%s896_s3 + $0x10] sm:$0xff]  ;;  %v141_v14 = vld [vmem:[%s896_s3 + $0x18] sm:$0xff]  ;;  %v248_v17 = vld [vmem:[%s899_s6] sm:$0xff]  ;;  %vm692_vm3 = vmmov 0   ;;  %s694_s30 = smov [#allocation2]   ;;  %vm561_vm4 = vcmask 60416  }
   0xd   :  { %v144_v15 = vld [vmem:[%s897_s4 + $0x10] sm:$0xff]  ;;  %v145_v16 = vld [vmem:[%s897_s4 + $0x18] sm:$0xff]  ;;  %v249_v18 = vld [vmem:[%s899_s6 + $0x8] sm:$0xff]  ;;  %s569_s4 = sshll.u32 %s694_s30, 4  ;;  %s570_s4 = int_to_ptr.vmem [resolvable:$true] %s569_s4 }
   0xe   :  { %v250_v19 = vld [vmem:[%s899_s6 + $0x10] sm:$0xff]  ;;  %v251_v20 = vld [vmem:[%s899_s6 + $0x18] sm:$0xff]  ;;  %v370_v21 = vld [vmem:[%s900_s7] sm:$0xff]  ;;  %s666_s12 = scalar_lea.vmem %s570_s4, 64  ;;  %p671_p1 = scmp.lt.s32.totalorder %s570_s4, %s570_s4 }
   0xf   :  { %223 = vperm.xlu1 %655, %v143_v12   ;;  %v371_v22 = vld [vmem:[%s900_s7 + $0x8] sm:$0xff]  ;;  %v374_v23 = vld [vmem:[%s901_s8] sm:$0xff]  ;;  %v372_v25 = vld [vmem:[%s900_s7 + $0x10] sm:$0xff]  ;;  %p667_p0 = scmp.ne.s32.totalorder %s570_s4, %s666_s12  ;;  %p672_p2 = scmp.lt.s32.totalorder %s666_s12, %s666_s12 }
  0x10   :  { %218 = vperm.xlu0 %654, %v142_v11   ;;  %v375_v24 = vld [vmem:[%s901_s8 + $0x8] sm:$0xff]  ;;  %v373_v26 = vld [vmem:[%s900_s7 + $0x18] sm:$0xff]  ;;  %v376_v27 = vld [vmem:[%s901_s8 + $0x10] sm:$0xff] }
  0x11   :  { %v377_v28 = vld [vmem:[%s901_s8 + $0x18] sm:$0xff]  ;;  %v476_v29 = vld [vmem:[%s903_s10] sm:$0xf]  ;;  %p673_p3 = por %p672_p2, %p671_p1 }
  0x12   :  { %v244_v30 = vld [vmem:[%s898_s5] sm:$0xff] }
  0x13   :  { %209 = vperm.xlu1 %655, %v141_v14   ;;  %617 = vmatprep.mubr.msk.f32.mxu1 %vm272_vm1, %v244_v30  ;;  %p674_p4 = pnand %p673_p3, %p667_p0 }
  0x14   :  { %204 = vperm.xlu0 %654, %v140_v13  }
  0x17   :  { %233 = vperm.xlu1 %655, %v145_v16  }
  0x18   :  { %228 = vperm.xlu0 %654, %v144_v15  }
  0x1b   :  { %259 = vperm.xlu1 %655, %v249_v18  }
  0x1c   :  { %254 = vperm.xlu0 %654, %v248_v17  }
  0x1f   :  { %269 = vperm.xlu1 %655, %v251_v20  }
  0x20   :  { %264 = vperm.xlu0 %654, %v250_v19  }
  0x23   :  { %430 = vperm.xlu1 %655, %v371_v22  }
  0x24   :  { %425 = vperm.xlu0 %654, %v370_v21  }
  0x27   :  { %454 = vperm.xlu1 %655, %v375_v24  }
  0x28   :  { %449 = vperm.xlu0 %654, %v374_v23  }
  0x2b   :  { %440 = vperm.xlu1 %655, %v373_v26  }
  0x2c   :  { %435 = vperm.xlu0 %654, %v372_v25  }
  0x2f   :  { %464 = vperm.xlu1 %655, %v377_v28  }
  0x30   :  { %459 = vperm.xlu0 %654, %v376_v27  }
  0x34   :  { %479 = vperm.xlu0 %654, %v476_v29  }
  0x81   :  { %v62_v32 = vpop.permute.xlu1 %61 }
  0x83   :  { %v52_v31 = vpop.permute.xlu0 %51 }
  0x85   :  { %v67_v39 = vpop.permute.xlu1 %66 }
  0x87   :  { %v57_v35 = vpop.permute.xlu0 %56 }
  0x8a   :  { %v200_v18 = vpop.permute.xlu1 %199 }
  0x8b   :  { %v195_v17 = vpop.permute.xlu0 %194 }
  0x8e   :  { %v224_v22 = vpop.permute.xlu1 %223 }
  0x8f   :  { %v219_v21 = vpop.permute.xlu0 %218 }
  0x92   :  { %v210_v24 = vpop.permute.xlu1 %209 }
  0x93   :  { %v205_v23 = vpop.permute.xlu0 %204 }
  0xdd   :  { %v607_v33 = vpop.f32.mrb[0].mxu0 }
  0xde   :  { %v123_v34 = vpop.f32.mrb[1].mxu0  ;;  %v132_v36 = vadd.f32 %v607_v33, %v62_v32 }
  0xdf   :  { %v124_v37 = vadd.f32 %v123_v34, %v52_v31  ;;  %v608_v38 = vpop.f32.mrb[2].mxu0  ;;  %v229_v34 = vpop.permute.xlu0 %228 }
  0xe0   :  { %v126_v40 = vpop.f32.mrb[3].mxu0  ;;  %v135_v42 = vadd.f32 %v608_v38, %v67_v39  ;;  %v163_v44 = vmul.f32 %v132_v36, %v132_v36  ;;  %v150_v49 = vsel %vm146_vm2, %v132_v36, 0.0 }
  0xe1   :  { %v161_v41 = vmul.f32 %v124_v37, %v124_v37  ;;  %v127_v43 = vadd.f32 %v126_v40, %v57_v35  ;;  %v147_v45 = vsel %vm146_vm2, %v124_v37, 0.0  ;;  %v234_v35 = vpop.permute.xlu1 %233 }
  0xe2   :  { %v164_v51 = vmul.f32 %v135_v42, %v135_v42  ;;  %v168_v55 = vsel %vm146_vm2, %v163_v44, 0.0  ;;  %v152_v56 = vsel %vm146_vm2, %v135_v42, 0.0 }
  0xe3   :  { %v148_v46 = vsel %vm146_vm2, %v127_v43, 0.0  ;;  %v162_v47 = vmul.f32 %v127_v43, %v127_v43  ;;  %v165_v50 = vsel %vm146_vm2, %v161_v41, 0.0 }
  0xe4   :  { %v149_v48 = vadd.f32 %v148_v46, %v147_v45  ;;  %v170_v59 = vsel %vm146_vm2, %v164_v51, 0.0  ;;  %v245_v46 = vld [vmem:[%s898_s5 + $0x8] sm:$0xff] }
  0xe5   :  { %v166_v52 = vsel %vm146_vm2, %v162_v47, 0.0  ;;  %v246_v47 = vld [vmem:[%s898_s5 + $0x10] sm:$0xff]  ;;  %v260_v51 = vpop.permute.xlu1 %259 }
  0xe6   :  { %v151_v53 = vadd.f32 %v150_v49, %v149_v48  ;;  %v167_v54 = vadd.f32 %v166_v52, %v165_v50  ;;  %v247_v48 = vld [vmem:[%s898_s5 + $0x18] sm:$0xff]  ;;  %v691_v49 = vmov 0.0|0.0   ;;  %v693_v50 = vmov 0.0   ;;  %v255_v52 = vpop.permute.xlu0 %254 }
  0xe7   :  { %642 = vmatprep.subr.bf16.mxu0 %v691_v49  ;;  %631 = vmatprep.mubr.msk.f32.mxu0 %vm692_vm3, %v693_v50 }
  0xe8   :  { %v153_v57 = vadd.f32 %v152_v56, %v151_v53  ;;  %v169_v58 = vadd.f32 %v168_v55, %v167_v54 }
  0xea   :  { %v154_v60 = vrot.slane %v153_v57, 4  ;;  %v171_v61 = vadd.f32 %v170_v59, %v169_v58  ;;  %v270_v59 = vpop.permute.xlu1 %269 }
  0xec   :  { %v155_v62 = vadd.f32 %v154_v60, %v153_v57  ;;  %v172_v63 = vrot.slane %v171_v61, 4 }
  0xee   :  { %v156_v0 = vrot.slane %v155_v62, 2  ;;  %v173_v1 = vadd.f32 %v172_v63, %v171_v61  ;;  %v265_v63 = vpop.permute.xlu0 %264 }
  0xf0   :  { %v157_v2 = vadd.f32 %v156_v0, %v155_v62  ;;  %v174_v3 = vrot.slane %v173_v1, 2 }
  0xf2   :  { %v158_v4 = vrot.slane %v157_v2, 1  ;;  %v175_v5 = vadd.f32 %v174_v3, %v173_v1 }
  0xf4   :  { %v159_v6 = vadd.f32 %v158_v4, %v157_v2  ;;  %v176_v7 = vrot.slane %v175_v5, 1 }
  0xf6   :  { %v160_v8 = vmul.f32 0.03125, %v159_v6  ;;  %v177_v9 = vadd.f32 %v176_v7, %v175_v5 }
  0xf8   :  { %v178_v10 = vmul.f32 0.03125, %v177_v9  ;;  %v179_v11 = vmul.f32 %v160_v8, %v160_v8  ;;  %v185_v12 = vsub.f32 %v127_v43, %v160_v8  ;;  %v184_v13 = vsub.f32 %v124_v37, %v160_v8 }
  0xf9   :  { %v186_v14 = vsub.f32 %v132_v36, %v160_v8  ;;  %v187_v15 = vsub.f32 %v135_v42, %v160_v8 }
  0xfa   :  { %v180_v16 = vsub.f32 %v178_v10, %v179_v11 }
  0xfc   :  { %v181_v19 = vmax.f32 %v180_v16, 0.0 }
  0xfe   :  { %v182_v20 = vadd.f32 1e-05, %v181_v19 }
 0x100   :  { %658 = vrsqrt.f32 %v182_v20 }
 0x10a   :  { %v659_v25 = vpop.eup %658 }
 0x10b   :  { %v189_v26 = vmul.f32 %v659_v25, %v185_v12  ;;  %v188_v27 = vmul.f32 %v659_v25, %v184_v13  ;;  %v190_v28 = vmul.f32 %v659_v25, %v186_v14  ;;  %v191_v29 = vmul.f32 %v659_v25, %v187_v15 }
 0x10d   :  { %v212_v30 = vmul.f32 %v195_v17, %v188_v27  ;;  %v213_v31 = vmul.f32 %v200_v18, %v189_v26  ;;  %v214_v32 = vmul.f32 %v205_v23, %v190_v28  ;;  %v215_v33 = vmul.f32 %v210_v24, %v191_v29 }
 0x10f   :  { %v236_v36 = vadd.f32 %v219_v21, %v212_v30  ;;  %v237_v37 = vadd.f32 %v224_v22, %v213_v31  ;;  %v238_v38 = vadd.f32 %v229_v34, %v214_v32  ;;  %v239_v39 = vadd.f32 %v234_v35, %v215_v33 }
 0x111   :  { %v240_v40 = vmax.f32 %v236_v36, 0.0  ;;  %v241_v41 = vmax.f32 %v237_v37, 0.0  ;;  %v242_v42 = vmax.f32 %v238_v38, 0.0  ;;  %v243_v43 = vmax.f32 %v239_v39, 0.0  ;;  %v426_v37 = vpop.permute.xlu0 %425  ;;  %v431_v38 = vpop.permute.xlu1 %430 }
 0x113   :  { %v634_v44 = vpack.c.bf16 %v241_v41, %v240_v40  ;;  %v638_v45 = vpack.c.bf16 %v243_v43, %v242_v42 }
 0x115   :  { %635 = vmatprep.subr.bf16.mxu1 %v634_v44  ;;  %v450_v41 = vpop.permute.xlu0 %449  ;;  %v455_v42 = vpop.permute.xlu1 %454 }
 0x116   :  { %637 = vmatpush3.bf16.msra.mxu1 %v634_v44 }
 0x117   :  { %639 = vmatprep.subr.bf16.mxu1 %v638_v45 }
 0x119   :  { %v436_v43 = vpop.permute.xlu0 %435  ;;  %v441_v44 = vpop.permute.xlu1 %440 }
 0x11a   :  { %641 = vmatpush3.bf16.msra.mxu1 %v638_v45 }
 0x11d   :  { %618 = vmatmul.mubr.msk.f32.vlgmr.msra.gmra.mrb[0].mxu1 %vm272_vm1, %v245_v46 }
 0x11e   :  { %620 = vmatprep.mubr.msk.f32.mxu1 %vm272_vm1, %v246_v47 }
 0x121   :  { %621 = vmatmul.mubr.msk.f32.gmra.mrb[2].mxu1 %vm272_vm1, %v247_v48 }
 0x1f0   :  { %v619_v53 = vpop.f32.mrb[0].mxu1 }
 0x1f1   :  { %v357_v54 = vadd.f32 %v619_v53, %v260_v51  ;;  %v351_v55 = vpop.f32.mrb[1].mxu1 }
 0x1f2   :  { %v352_v56 = vadd.f32 %v351_v55, %v255_v52  ;;  %v460_v55 = vpop.permute.xlu0 %459 }
 0x1f3   :  { %v379_v57 = vsel %vm146_vm2, %v357_v54, 0.0  ;;  %v393_v58 = vmul.f32 %v357_v54, %v357_v54 }
 0x1f4   :  { %v378_v60 = vsel %vm146_vm2, %v352_v56, 0.0  ;;  %v392_v61 = vmul.f32 %v352_v56, %v352_v56  ;;  %v622_v62 = vpop.f32.mrb[2].mxu1 }
 0x1f5   :  { %v397_v0 = vsel %vm146_vm2, %v393_v58, 0.0  ;;  %v380_v1 = vadd.f32 %v379_v57, %v378_v60  ;;  %v367_v2 = vadd.f32 %v622_v62, %v270_v59  ;;  %v361_v3 = vpop.f32.mrb[3].mxu1 }
 0x1f6   :  { %v396_v4 = vsel %vm146_vm2, %v392_v61, 0.0  ;;  %v362_v5 = vadd.f32 %v361_v3, %v265_v63  ;;  %v475_v3 = vld [vmem:[%s902_s9] sm:$0xf] }
 0x1f7   :  { %v398_v6 = vadd.f32 %v397_v0, %v396_v4  ;;  %v395_v7 = vmul.f32 %v367_v2, %v367_v2  ;;  %v383_v11 = vsel %vm146_vm2, %v367_v2, 0.0  ;;  %v480_v4 = vpop.permute.xlu0 %479 }
 0x1f8   :  { %v381_v8 = vsel %vm146_vm2, %v362_v5, 0.0  ;;  %v394_v9 = vmul.f32 %v362_v5, %v362_v5 }
 0x1f9   :  { %v382_v10 = vadd.f32 %v381_v8, %v380_v1  ;;  %v401_v15 = vsel %vm146_vm2, %v395_v7, 0.0 }
 0x1fa   :  { %v399_v12 = vsel %vm146_vm2, %v394_v9, 0.0 }
 0x1fb   :  { %v384_v13 = vadd.f32 %v383_v11, %v382_v10  ;;  %v400_v14 = vadd.f32 %v399_v12, %v398_v6 }
 0x1fd   :  { %v385_v16 = vrot.slane %v384_v13, 4  ;;  %v402_v17 = vadd.f32 %v401_v15, %v400_v14 }
 0x1ff   :  { %v386_v18 = vadd.f32 %v385_v16, %v384_v13  ;;  %v403_v19 = vrot.slane %v402_v17, 4 }
 0x201   :  { %v387_v20 = vrot.slane %v386_v18, 2  ;;  %v404_v21 = vadd.f32 %v403_v19, %v402_v17 }
 0x203   :  { %v388_v22 = vadd.f32 %v387_v20, %v386_v18  ;;  %v405_v23 = vrot.slane %v404_v21, 2 }
 0x205   :  { %v389_v24 = vrot.slane %v388_v22, 1  ;;  %v406_v25 = vadd.f32 %v405_v23, %v404_v21 }
 0x207   :  { %v390_v26 = vadd.f32 %v389_v24, %v388_v22  ;;  %v407_v27 = vrot.slane %v406_v25, 1 }
 0x209   :  { %v391_v28 = vmul.f32 0.03125, %v390_v26  ;;  %v408_v29 = vadd.f32 %v407_v27, %v406_v25 }
 0x20b   :  { %v409_v30 = vmul.f32 0.03125, %v408_v29  ;;  %v410_v31 = vmul.f32 %v391_v28, %v391_v28  ;;  %v417_v32 = vsub.f32 %v362_v5, %v391_v28  ;;  %v415_v33 = vsub.f32 %v352_v56, %v391_v28  ;;  %v465_v56 = vpop.permute.xlu1 %464 }
 0x20c   :  { %v416_v34 = vsub.f32 %v357_v54, %v391_v28  ;;  %v418_v35 = vsub.f32 %v367_v2, %v391_v28 }
 0x20d   :  { %v411_v36 = vsub.f32 %v409_v30, %v410_v31 }
 0x20f   :  { %v412_v39 = vmax.f32 %v411_v36, 0.0 }
 0x211   :  { %v413_v40 = vadd.f32 1e-05, %v412_v39 }
 0x213   :  { %660 = vrsqrt.f32 %v413_v40 }
 0x21d   :  { %v661_v45 = vpop.eup %660 }
 0x21e   :  { %v421_v46 = vmul.f32 %v661_v45, %v417_v32  ;;  %v419_v47 = vmul.f32 %v661_v45, %v415_v33  ;;  %v420_v48 = vmul.f32 %v661_v45, %v416_v34  ;;  %v422_v50 = vmul.f32 %v661_v45, %v418_v35 }
 0x220   :  { %v445_v51 = vmul.f32 %v436_v43, %v421_v46  ;;  %v443_v52 = vmul.f32 %v426_v37, %v419_v47  ;;  %v444_v53 = vmul.f32 %v431_v38, %v420_v48  ;;  %v446_v54 = vmul.f32 %v441_v44, %v422_v50 }
 0x222   :  { %v467_v57 = vadd.f32 %v450_v41, %v443_v52  ;;  %v468_v58 = vadd.f32 %v455_v42, %v444_v53  ;;  %v469_v59 = vadd.f32 %v460_v55, %v445_v51  ;;  %v470_v60 = vadd.f32 %v465_v56, %v446_v54 }
 0x224   :  { %v471_v61 = vmax.f32 %v467_v57, 0.0  ;;  %v472_v62 = vmax.f32 %v468_v58, 0.0  ;;  %v473_v63 = vmax.f32 %v469_v59, 0.0  ;;  %v474_v0 = vmax.f32 %v470_v60, 0.0 }
 0x226   :  { %v643_v1 = vpack.c.bf16 %v472_v62, %v471_v61  ;;  %v646_v2 = vpack.c.bf16 %v474_v0, %v473_v63 }
 0x228   :  { %644 = vmatpush3.bf16.msra.mxu0 %v643_v1 }
 0x229   :  { %645 = vmatprep.subr.bf16.mxu0 %v691_v49 }
 0x22c   :  { %647 = vmatpush3.bf16.msra.mxu0 %v646_v2 }
 0x22f   :  { %632 = vmatmul.mubr.msk.f32.vlgmr.msra.gmra.mrb[4].mxu0 %vm272_vm1, %v475_v3 }
 0x302   :  { %v551_v5 = vpop.f32.mrb[4].mxu0 }
 0x303   :  { %v552_v6 = vadd.f32 %v551_v5, %v480_v4  ;;  %v633_v7 = vpop.f32.mrb[5].mxu0 }
 0x305   :  { %v586_v8 = vmul.f32 -1.442695, %v552_v6 }
 0x307   :  { %662 = vpow2.f32 %v586_v8 }
 0x311   :  { %v663_v9 = vpop.eup %662 }
 0x312   :  { %v558_v10 = vadd.f32 1.0, %v663_v9 }
 0x314   :  { %664 = vrcp.f32 %v558_v10 }
 0x31e   :  { %v665_v49 = vpop.eup %664 }
 0x31f   :  { %562 = vst.msk [vmem:[#allocation2] sm:$0xf] %vm561_vm4, %v665_v49 }
 0x320   :  { %677 = shalt.err (!%p674_p4)
}
 0x321   :  { %s678_s14 = scalar_lea.hbm %s904_s11, 64 }
 0x322   :  { %p679_p5 = scmp.ne.s32.totalorder %s904_s11, %s678_s14  ;;  %p682_p6 = scmp.lt.u32.totalorder %s678_s14, %s904_s11 }
 0x324   :  { %p684_p7 = pnand %p682_p6, %p679_p5 }
 0x326   :  { %687 = shalt.err (!%p684_p7)
}
 0x327   :  { %572 = dma.vmem_to_hbm [thread:$0]  %s570_s4, 64, %s904_s11, [#allocation3]  }
 0x328   :  { %688 = dma.done.wait [#allocation3], 64  }
 0x329   :  { %689 = vsyncadd [#allocation3], 4294967232 }
 0x32a   :  { %576 = vsyncpa [#allocation3], 1 }

</bundles_post_ra>
